<compile_context>
chip_gen: v7x
topology: tpu7x:2x2x1
jax: 0.10.0
libtpu: 0.0.40
codegen_flags: <defaults>
</compile_context>

<pallas_src>
import numpy as np
import jax
import jax.numpy as jnp
from jax.experimental import pallas as pl
from jax.experimental.pallas import tpu as pltpu


def build_grid(resolution):
    """Same as the PyTorch build_grid: returns [1, H, W, 4] float32."""
    ranges = [np.linspace(0.0, 1.0, res) for res in resolution]
    grid = np.meshgrid(*ranges, sparse=False, indexing="ij")
    grid = np.stack(grid, axis=-1)
    grid = grid.reshape(resolution[0], resolution[1], -1)
    grid = np.expand_dims(grid, axis=0).astype("float32")
    return np.concatenate([grid, 1.0 - grid], axis=-1)  # [1, H, W, 4]


def _add_pos_kernel(x_ref, pos_ref, o_ref):
    # x_ref  : [TB, TN]  (lane-dense flattened spatial*channel chunk)
    # pos_ref: [1,  TN]  f32 (same chunk of the precomputed position embedding)
    # Accumulate in f32, cast only at the final store.
    o_ref[...] = (x_ref[...].astype(jnp.float32) + pos_ref[...]).astype(o_ref.dtype)


def _round_down(v, m):
    return (v // m) * m


def _round_up(v, m):
    return ((v + m - 1) // m) * m


def _choose_tiles(B, N, x_item, target_block_bytes, vmem_block_budget):
    """Pick (TB, TN) for a [B, N] + [1, N] broadcast add.

    TN is a multiple of 128 (or the full extent when N <= 128 / when a single
    block is best); raggedness is handled by pl.cdiv + Pallas masking, never
    by shrinking to tiny divisor tiles.  TB defaults to the full batch so pos
    is streamed exactly once; when the batch must be tiled, TB is a multiple
    of the sublane packing for the dtype.
    """
    LANE = 128
    POS_ITEM = 4  # pos is kept in f32
    # Sublane packing of the batch dim: 8 rows for 32-bit, 16 bf16, 32 int8/fp8.
    pack = 8 * max(1, 4 // max(x_item, 1))

    def footprint(tb, tn):
        # double-buffered x block + out block + pos block
        return 2 * tb * tn * (2 * x_item) + 2 * tn * POS_ITEM

    # --- lane tile ---
    if N <= LANE:
        TN = N  # full-extent block, always legal
    else:
        tn = _round_down(max(LANE, target_block_bytes // max(B * x_item, 1)), LANE)
        TN = N if tn >= N else tn  # full extent beats oversized ragged block
    TB = B

    # Guarantee >= 2 grid steps along the parallel N axis so both v7x
    # TensorCores (and their DMA engines) get work; harmless on v5e/v6e.
    if N > LANE and pl.cdiv(N, TN) < 2:
        half = _round_up(pl.cdiv(N, 2), LANE)
        if half < N:
            TN = half

    # --- shrink TN to the VMEM block budget (real dtype, full pipeline) ---
    while footprint(TB, TN) > vmem_block_budget and N > LANE and TN > LANE:
        TN = max(LANE, _round_down(TN // 2, LANE))

    # --- if still over budget (huge batch), tile the batch too ---
    if footprint(TB, TN) > vmem_block_budget and B > pack:
        per_row = 2 * TN * (2 * x_item)
        avail = max(vmem_block_budget - 2 * TN * POS_ITEM, per_row * pack)
        TB = max(pack, min(B, _round_down(avail // per_row, pack)))

    return TB, TN


def soft_position_embed(x_nhwc, grid_1hw4, weight_d4, bias_d, *,
                        target_block_bytes=4 << 20, donate_x=False):
    """x_nhwc: [B,H,W,D]; grid_1hw4: [1,H,W,4]; weight_d4: [D,4]; bias_d: [D]."""
    B, H, W, D = x_nhwc.shape
    N = H * W * D
    x_item = jnp.dtype(x_nhwc.dtype).itemsize

    # --- Hoist fc(grid): one tiny [HW,4]@[4,D] + bias, identical for every
    # batch element, so it does not belong inside the per-batch/per-tile loop.
    pos = jnp.dot(grid_1hw4.reshape(-1, 4).astype(jnp.float32),
                  weight_d4.astype(jnp.float32).T) + bias_d.astype(jnp.float32)
    pos_flat = pos.reshape(1, N)               # [1, HW*D], f32
    x_flat = x_nhwc.reshape(B, N)              # lane-dense flattened layout

    # Blocks-in-flight budget: safe on v5e (16 MiB scoped default), v6e, and
    # v7x (64 MiB physical per TC) when set explicitly below.
    vmem_block_budget = 16 << 20
    TB, TN = _choose_tiles(B, N, x_item, target_block_bytes, vmem_block_budget)

    n_tiles = pl.cdiv(N, TN)
    b_tiles = pl.cdiv(B, TB)

    # Explicit VMEM budget: double-buffered x/out/pos blocks + headroom.
    footprint = 2 * TB * TN * (2 * x_item) + 2 * TN * 4
    vmem_limit = int(min(100 << 20, footprint + (8 << 20)))

    out_flat = pl.pallas_call(
        _add_pos_kernel,
        out_shape=jax.ShapeDtypeStruct((B, N), x_nhwc.dtype),
        grid_spec=pltpu.PrefetchScalarGridSpec(
            num_scalar_prefetch=0,
            # N is the OUTER axis, batch the INNER axis: the pos block index
            # is constant across consecutive batch steps, so pos is DMA'd
            # once per N tile instead of once per (batch tile, N tile).
            grid=(n_tiles, b_tiles),
            in_specs=[
                pl.BlockSpec((TB, TN), lambda j, i: (i, j)),   # x tile
                pl.BlockSpec((1, TN), lambda j, i: (0, j)),    # pos tile
            ],
            out_specs=pl.BlockSpec((TB, TN), lambda j, i: (i, j)),
        ),
        compiler_params=pltpu.CompilerParams(
            dimension_semantics=("parallel", "parallel"),
            vmem_limit_bytes=vmem_limit),
        input_output_aliases=({0: 0} if donate_x else {}),
    )(x_flat, pos_flat)

    return out_flat.reshape(B, H, W, D)


def _reference(x, grid, weight, bias):
    pos = jnp.einsum("ohwc,dc->ohwd", grid.astype(jnp.float32),
                     weight.astype(jnp.float32)) + bias.astype(jnp.float32)
    return (x.astype(jnp.float32) + pos).astype(x.dtype)


if __name__ == "__main__":
    key = jax.random.PRNGKey(0)
    kx, kw, kb, kx2 = jax.random.split(key, 4)

    # --- Case 1: canonical small shape, f32 ---------------------------------
    B, H, W, D = 2, 16, 16, 32
    weight = jax.random.normal(kw, (D, 4), dtype=jnp.float32) * 0.1   # [out, in]
    bias = jax.random.normal(kb, (D,), dtype=jnp.float32) * 0.1
    x = jax.random.normal(kx, (B, H, W, D), dtype=jnp.float32)
    grid = jnp.asarray(build_grid((H, W)))                            # [1,H,W,4]
    ref = _reference(x, grid, weight, bias)

    out = jax.block_until_ready(soft_position_embed(x, grid, weight, bias))
    assert out.shape == (B, H, W, D)
    np.testing.assert_allclose(np.asarray(out), np.asarray(ref), rtol=1e-5, atol=1e-5)

    # Forced small tile: exercises multi-step grid / index maps.
    out2 = jax.block_until_ready(
        soft_position_embed(x, grid, weight, bias, target_block_bytes=16 * 1024))
    np.testing.assert_allclose(np.asarray(out2), np.asarray(ref), rtol=1e-5, atol=1e-5)

    # Donatable-x path (input_output_aliases): same numerics.
    out3 = jax.block_until_ready(
        soft_position_embed(x, grid, weight, bias, donate_x=True))
    np.testing.assert_allclose(np.asarray(out3), np.asarray(ref), rtol=1e-5, atol=1e-5)

    # --- Case 2: awkward N (not a multiple of 128) -> ragged masked block ---
    B2, H2, W2, D2 = 3, 10, 10, 20   # N = 2000
    x_r = jax.random.normal(kx2, (B2, H2, W2, D2), dtype=jnp.float32)
    grid_r = jnp.asarray(build_grid((H2, W2)))
    ref_r = _reference(x_r, grid_r, weight[:D2, :], bias[:D2])
    out_r = jax.block_until_ready(
        soft_position_embed(x_r, grid_r, weight[:D2, :], bias[:D2]))
    np.testing.assert_allclose(np.asarray(out_r), np.asarray(ref_r), rtol=1e-5, atol=1e-5)

    # --- Case 3: bf16 input (dtype-aware tile sizing / packing) -------------
    x_bf = x.astype(jnp.bfloat16)
    ref_bf = _reference(x_bf, grid, weight, bias)
    out_bf = jax.block_until_ready(soft_position_embed(x_bf, grid, weight, bias))
    np.testing.assert_allclose(np.asarray(out_bf, dtype=np.float32),
                               np.asarray(ref_bf, dtype=np.float32),
                               rtol=2e-2, atol=2e-2)

    print("KERNEL_OK")
</pallas_src>

<mosaic_0001>
module attributes {stable_mosaic.version = 11 : i64} {
  func.func @_add_pos_kernel(%arg0: i32, %arg1: i32, %arg2: memref<2x4096xf32, #tpu.memory_space<vmem>>, %arg3: memref<1x4096xf32, #tpu.memory_space<vmem>>, %arg4: memref<2x4096xf32, #tpu.memory_space<vmem>>) attributes {dimension_semantics = [#tpu.dimension_semantics<parallel>, #tpu.dimension_semantics<parallel>], iteration_bounds = array<i64: 2, 1>, scalar_prefetch = 0 : i64, scratch_operands = 0 : i64, tpu.core_type = #tpu.core_type<tc>, window_params = [{transform_indices = @transform_0, window_bounds = array<i64: 2, 4096>}, {transform_indices = @transform_1, window_bounds = array<i64: 1, 4096>}, {transform_indices = @transform_2, window_bounds = array<i64: 2, 4096>}]} {
    %c0 = arith.constant 0 : index
    %c0_0 = arith.constant 0 : index
    %0 = vector.load %arg2[%c0, %c0_0] : memref<2x4096xf32, #tpu.memory_space<vmem>>, vector<2x4096xf32>
    %c0_1 = arith.constant 0 : index
    %c0_2 = arith.constant 0 : index
    %1 = vector.load %arg3[%c0_1, %c0_2] : memref<1x4096xf32, #tpu.memory_space<vmem>>, vector<1x4096xf32>
    %2 = vector.broadcast %1 : vector<1x4096xf32> to vector<2x4096xf32>
    %3 = arith.addf %0, %2 : vector<2x4096xf32>
    %c0_3 = arith.constant 0 : index
    %c0_4 = arith.constant 0 : index
    %4 = vector.load %arg4[%c0_3, %c0_4] : memref<2x4096xf32, #tpu.memory_space<vmem>>, vector<2x4096xf32>
    tpu.vector_store %arg4[%c0_3, %c0_4], %3 {strides = array<i32>} : memref<2x4096xf32, #tpu.memory_space<vmem>>, vector<2x4096xf32>,
    return
  }
  func.func @transform_0(%arg0: i32, %arg1: i32) -> (i32, i32) {
    %c0_i32 = arith.constant 0 : i32
    return %arg1, %arg0 : i32, i32
  }
  func.func @transform_1(%arg0: i32, %arg1: i32) -> (i32, i32) {
    %c0_i32 = arith.constant 0 : i32
    %c0_i32_0 = arith.constant 0 : i32
    return %c0_i32, %arg0 : i32, i32
  }
  func.func @transform_2(%arg0: i32, %arg1: i32) -> (i32, i32) {
    %c0_i32 = arith.constant 0 : i32
    return %arg1, %arg0 : i32, i32
  }
}

</mosaic_0001>

<bundles_post_ra>
// kernel: tpu_custom_call.1
= control target key start
LH: loop header
LB: loop body
LE: loop exit
PB: predicated region body
PF: predicated region fallthrough
CT: control target
= control target key end

     0   :  { %7 = vsyncpa [#allocation3], 0  ;;  %s1216_s0 = inlined_call_operand.hbm [shape: f32[2,8192], index: 0, kind: input, shape index: {}]   ;;  %s1217_s1 = inlined_call_operand.hbm [shape: f32[1,8192], index: 1, kind: input, shape index: {}]   ;;  %s1218_s2 = inlined_call_operand.hbm [shape: f32[2,8192], index: 2, kind: output, shape index: {}]  }
   0x1   :  { %9 = vsyncpa [#allocation3 + $0x1], 0 }
   0x2   :  { %10 = vsyncpa [#allocation6], 0 }
   0x3   :  { %12 = vsyncpa [#allocation6 + $0x1], 0 }
   0x4   :  { %13 = vsyncpa [#allocation4], 0 }
   0x5   :  { %15 = vsyncpa [#allocation4 + $0x1], 0  ;;  %s904_s9 = smov 0   ;;  %s906_s10 = smov 0  }
   0x6   :  { %s908_s11 = smov 0   ;;  %s910_s12 = smov 0  }
   0x7   :  { %s912_s13 = smov 0   ;;  %s914_s14 = smov 0  }
   0x8 LB: > { %s647_s15 = sadd.s32 4294967295, %s883_s14   ;;  %s648_s16 = sadd.s32 4294967294, %s883_s14   ;;  %s883_s14 = sphi %s914_s14, %s21_s14   ;;  %s879_s13 = sphi %s912_s13, %s1238_s13   ;;  %s875_s12 = sphi %s910_s12, %s1237_s12   ;;  %s871_s11 = sphi %s908_s11, %s1236_s11   ;;  %s867_s10 = sphi %s906_s10, %s1235_s10   ;;  %s863_s9 = sphi %s904_s9, %s1234_s9  }
   0x9   : > { %s33_s17 = sadd.s32 1, %s879_s13  ;;  %s42_s18 = sadd.s32 1, %s871_s11 }
   0xa   : > { %p35_p0 = scmp.ge.s32.totalorder %s33_s17, 2  ;;  %p49_p1 = scmp.ne.s32.totalorder %s871_s11, %s867_s10 }
   0xb   : > { %p50_p2 = scmp.eq.s32.totalorder %s883_s14, 0  ;;  %p55_p3 = scmp.ne.s32.totalorder %s867_s10, %s863_s9 }
   0xc   : > { %s1240_s17 = smov (%p35_p0, %s33_s17), 0  ;;  %p56_p5 = scmp.eq.s32.totalorder %s647_s15, 0 }
   0xd   : > { %p945_p4 = por %p50_p2, %p49_p1  ;;  %s38_s20 = ssub.s32 %s879_s13, %s1240_s17 }
   0xe   : > { %p107_p6 = scmp.eq.s32.totalorder %s647_s15, 1  ;;  %p40_p7 = scmp.eq.s32.totalorder %s38_s20, 0 }
   0xf   : > { %p951_p8 = por %p56_p5, %p55_p3  ;;  %p113_p10 = scmp.eq.s32.totalorder %s648_s16, 1 }
  0x10   : > { %p955_p9 = por %p107_p6, %p49_p1  ;;  %p686_p13 = scmp.lt.s32.totalorder %s883_s14, 2 }
  0x11   : > { %s1222_s21 = scalar_select %p951_p8, 1, 0 }
  0x12   : > { %s1223_s22 = scalar_select %p955_p9, 1, 0 }
  0x13   : > { %s960_s23 = scalar_select %p40_p7, %s871_s11, %s42_s18  }
  0x14   : > { %p962_p11 = por %p113_p10, %p55_p3  ;;  %s969_s25 = sand.u32 1, %s871_s11  }
  0x15   : > { %s651_s26 = sshll.u32 %s969_s25, 6  ;;  %s666_s27 = sshll.u32 %s879_s13, 10 }
  0x16   : > { %s1224_s24 = scalar_select %p962_p11, 1, 0 }
  0x17   : > { %s976_s30 = scalar_lea.hbm %s1216_s0, %s666_s27  ;;  %s137_s3 = scalar_lea.vmem [#allocation2], %s651_s26 }
  0x18   : > { %s147_s4 = sshll.u32 %s137_s3, 4  ;;  %p982_p0 = pnand %p686_p13, %p945_p4  ;;  %s978_s4 = int_to_ptr.vmem [resolvable:$true] %s147_s4 }
  0x19   : > { %s134_s6 = scalar_lea.sflag [#allocation3], %s969_s25  ;;  %s737_s7 = scalar_lea.hbm %s976_s30, 1024 }
  0x1a   : > { %p738_p3 = scmp.ne.s32.totalorder %s976_s30, %s737_s7  ;;  %p739_p5 = pneg %p982_p0 }
  0x1b   : > { %s742_s16 = scalar_lea.hbm %s1216_s0, 2048  ;;  %p743_p4 = scmp.lt.u32.totalorder %s976_s30, %s1216_s0 }
  0x1c   : > { %p740_p6 = pnand %p739_p5, %p738_p3  ;;  %p744_p10 = scmp.lt.u32.totalorder %s742_s16, %s737_s7 }
  0x1d   : > { %p746_p12 = scmp.lt.u32.totalorder %s737_s7, %s976_s30 }
  0x1e   : > { %p741_p7 = pneg %p740_p6  ;;  %p745_p13 = por %p744_p10, %p743_p4 }
  0x20   : > { %p747_p1 = por %p746_p12, %p745_p13 }
  0x22   : > { %p748_p2 = pnand %p747_p1, %p741_p7 }
  0x24   : > { %751 = shalt.err (!%p748_p2)
}
  0x25   : > { %s752_s20 = scalar_lea.vmem %s978_s4, 1024  ;;  %s885_s26 = smov [#allocation2]  }
  0x26   : > { %p753_p3 = scmp.ne.s32.totalorder %s978_s4, %s752_s20  ;;  %s757_s27 = sshll.u32 %s885_s26, 4  ;;  %s758_s27 = int_to_ptr.vmem [resolvable:$false] %s757_s27 }
  0x27   : > { %s759_s28 = scalar_lea.vmem %s758_s27, 2048  ;;  %p760_p9 = scmp.lt.s32.totalorder %s978_s4, %s758_s27 }
  0x28   : > { %p755_p6 = pnand %p753_p3, %p739_p5  ;;  %p761_p4 = scmp.lt.s32.totalorder %s759_s28, %s752_s20 }
  0x2a   : > { %p756_p11 = pneg %p755_p6  ;;  %p762_p10 = por %p761_p4, %p760_p9 }
  0x2c   : > { %p763_p12 = pnand %p762_p10, %p756_p11 }
  0x2e   : > { %766 = shalt.err (!%p763_p12)
}
  0x2f   : > { %678 = dma.hbm_to_vmem [thread:$0]  (!%p982_p0), %s976_s30, 1024, %s978_s4, %s134_s6  }
  0x30   : > { %p1226_p1 = scmp.lt.s32.totalorder %s883_s14, 3  ;;  %p1227_p2 = scmp.ge.s32.totalorder %s883_s14, 1 }
  0x31   : > { %s654_s3 = sshll.u32 %s969_s25, 5  ;;  %s667_s7 = sshll.u32 %s879_s13, 9 }
  0x32   : > { %p1018_p7 = pnand %p1227_p2, %p1226_p1  ;;  %s1027_s16 = scalar_lea.hbm %s1217_s1, %s667_s7 }
  0x33   : > { %s158_s18 = scalar_lea.vmem [#allocation5], %s654_s3  ;;  %s155_s30 = scalar_lea.sflag [#allocation6], %s969_s25 }
  0x34   : > { %s1228_s29 = scalar_select %p1018_p7, 1, 0 }
  0x35   : > { %s166_s19 = sshll.u32 %s158_s18, 4  ;;  %s767_s4 = scalar_lea.hbm %s1027_s16, 512  ;;  %s167_s19 = int_to_ptr.vmem [resolvable:$true] %s166_s19 }
  0x36   : > { %p768_p9 = scmp.ne.s32.totalorder %s1027_s16, %s767_s4  ;;  %s772_s26 = scalar_lea.hbm %s1217_s1, 1024 }
  0x37   : > { %p773_p3 = scmp.lt.u32.totalorder %s1027_s16, %s1217_s1  ;;  %p774_p6 = scmp.lt.u32.totalorder %s772_s26, %s767_s4 }
  0x38   : > { %p770_p11 = pnand %p768_p9, %p739_p5  ;;  %p776_p10 = scmp.lt.u32.totalorder %s767_s4, %s1027_s16 }
  0x39   : > { %p775_p4 = por %p774_p6, %p773_p3 }
  0x3a   : > { %p771_p13 = pneg %p770_p11 }
  0x3b   : > { %p777_p12 = por %p776_p10, %p775_p4 }
  0x3d   : > { %p778_p1 = pnand %p777_p12, %p771_p13 }
  0x3f   : > { %781 = shalt.err (!%p778_p1)
}
  0x40   : > { %s782_s25 = scalar_lea.vmem %s167_s19, 512  ;;  %s886_s3 = smov [#allocation5]  }
  0x41   : > { %p783_p2 = scmp.ne.s32.totalorder %s167_s19, %s782_s25  ;;  %s787_s7 = sshll.u32 %s886_s3, 4  ;;  %s788_s7 = int_to_ptr.vmem [resolvable:$false] %s787_s7 }
  0x42   : > { %s789_s8 = scalar_lea.vmem %s788_s7, 1024  ;;  %p790_p8 = scmp.lt.s32.totalorder %s167_s19, %s788_s7 }
  0x43   : > { %p785_p9 = pnand %p783_p2, %p739_p5  ;;  %p791_p7 = scmp.lt.s32.totalorder %s789_s8, %s782_s25 }
  0x45   : > { %p786_p11 = pneg %p785_p9  ;;  %p792_p3 = por %p791_p7, %p790_p8 }
  0x47   : > { %p793_p6 = pnand %p792_p3, %p786_p11 }
  0x49   : > { %796 = shalt.err (!%p793_p6)
}
  0x4a   : > { %681 = dma.hbm_to_vmem [thread:$0]  (!%p982_p0), %s1027_s16, 512, %s167_s19, %s155_s30  }
  0x4b   : > { %p1229_p13 = scmp.ne.s32.totalorder %s1228_s29, 0 }
  0x4c   : > { %s1052_s15 = sand.u32 (!%p1229_p13), 1, %s867_s10   ;;  %p1230_p8 = scmp.ne.s32.totalorder (!%p1229_p13), %s1222_s21, 0 }
  0x4d   : > { %175 = sbr.rel (%p1229_p13) target bundleno = 134 (0x86), region = 28  ;;  %s658_s18 = sshll.u32 (!%p1229_p13), %s1052_s15, 6 }
  0x4e   : > { %s178_s4 = scalar_lea.sflag (!%p1229_p13), [#allocation3], %s1052_s15  ;;  %s1058_s6 = scalar_lea.vmem (!%p1229_p13), [#allocation2], %s658_s18 }
  0x54   : > { %850 = dma.done.wait (%p1230_p8), %s178_s4, 1024  }
  0x55   : > { %852 = vsyncadd (%p1230_p8), %s178_s4, 4294966272  ;;  %s659_s5 = sshll.u32 %s1052_s15, 5  ;;  %s187_s29 = scalar_lea.sflag [#allocation6], %s1052_s15 }
  0x56   : > { %s1066_s16 = scalar_lea.vmem [#allocation5], %s659_s5 }
  0x57   : > { %854 = dma.done.wait (%p1230_p8), %s187_s29, 512  }
  0x58   : > { %856 = vsyncadd (%p1230_p8), %s187_s29, 4294966784  ;;  %v235_v0 = vlaneseq  ;;  %v887_v1 = vmov 1983009808   ;;  %v227_v13 = vld [vmem:[%s1066_s16] sm:$0xff]  ;;  %v228_v19 = vld [vmem:[%s1066_s16 + $0x8] sm:$0xff]  ;;  %s1126_s21 = scalar_lea.vmem [#allocation7], %s658_s18 }
  0x59   : > { %v366_v2 = vunpack.c.l.s4 %v887_v1  ;;  %v229_v36 = vld [vmem:[%s1066_s16 + $0x10] sm:$0xff]  ;;  %v219_v37 = vld [vmem:[%s1058_s6] sm:$0xff]  ;;  %v220_v43 = vld [vmem:[%s1058_s6 + $0x8] sm:$0xff]  ;;  %s668_s19 = sshll.u32 %s875_s12, 10  ;;  %s540_s30 = sshll.u32 %s1126_s21, 4  ;;  %s1168_s30 = int_to_ptr.vmem [resolvable:$true] %s540_s30 }
  0x5a   : > { %v236_v3 = vshrl.u32 %v235_v0, 7  ;;  %v221_v52 = vld [vmem:[%s1058_s6 + $0x10] sm:$0xff]  ;;  %v230_v60 = vld [vmem:[%s1066_s16 + $0x18] sm:$0xff]  ;;  %s1166_s27 = scalar_lea.hbm %s1218_s2, %s668_s19  ;;  %s524_s28 = scalar_lea.sflag [#allocation4], %s1052_s15 }
  0x5b   : > { %v367_v4 = vunpack.c.0.s8 %v366_v2  ;;  %v222_v2 = vld [vmem:[%s1058_s6 + $0x18] sm:$0xff]  ;;  %s797_s25 = scalar_lea.vmem %s1168_s30, 1024  ;;  %p1231_p5 = scmp.ne.s32.totalorder %s1223_s22, 0 }
  0x5c   : > { %v1072_v5 = vsub.s32 0, %v236_v3  ;;  %v1074_v6 = vsub.s32 1, %v236_v3  ;;  %v1076_v7 = vsub.s32 2, %v236_v3  ;;  %v1078_v8 = vsub.s32 3, %v236_v3  ;;  %p798_p0 = scmp.ne.s32.totalorder %s1168_s30, %s797_s25  ;;  %s888_s12 = smov [#allocation7]  }
  0x5d   : > { %v1080_v9 = vsub.s32 4, %v236_v3  ;;  %v1082_v10 = vsub.s32 5, %v236_v3  ;;  %v1084_v11 = vsub.s32 6, %v236_v3  ;;  %v1086_v12 = vsub.s32 7, %v236_v3  ;;  %s801_s3 = sshll.u32 %s888_s12, 4  ;;  %s802_s3 = int_to_ptr.vmem [resolvable:$false] %s801_s3 }
  0x5e   : > { %v1089_v14 = vsub.s32 %v367_v4, %v236_v3  ;;  %v238_v15 = vrot.slane %v227_v13, %v1072_v5  ;;  %v242_v16 = vrot.slane %v227_v13, %v1074_v6  ;;  %v246_v17 = vrot.slane %v227_v13, %v1076_v7  ;;  %p799_p7 = pnand %p798_p0, %p1231_p5  ;;  %s803_s7 = scalar_lea.vmem %s802_s3, 2048 }
  0x5f   : > { %v250_v18 = vrot.slane %v227_v13, %v1078_v8  ;;  %v254_v20 = vrot.slane %v227_v13, %v1080_v9  ;;  %v258_v21 = vrot.slane %v227_v13, %v1082_v10  ;;  %v262_v22 = vrot.slane %v227_v13, %v1084_v11  ;;  %p804_p10 = scmp.lt.s32.totalorder %s1168_s30, %s802_s3  ;;  %p805_p12 = scmp.lt.s32.totalorder %s803_s7, %s797_s25 }
  0x60   : > { %v266_v23 = vrot.slane %v227_v13, %v1086_v12  ;;  %v363_v24 = vcombine.low %v238_v15, %v242_v16  ;;  %v270_v26 = vrot.slane %v228_v19, %v1072_v5  ;;  %v274_v27 = vrot.slane %v228_v19, %v1074_v6  ;;  %p800_p4 = pneg %p799_p7 }
  0x61   : > { %v364_v25 = vcombine.low %v246_v17, %v250_v18  ;;  %v380_v28 = vcombine.low %v254_v20, %v258_v21  ;;  %v278_v30 = vrot.slane %v228_v19, %v1076_v7  ;;  %v282_v31 = vrot.slane %v228_v19, %v1078_v8  ;;  %p806_p1 = por %p805_p12, %p804_p10 }
  0x62   : > { %v381_v29 = vcombine.low %v262_v22, %v266_v23  ;;  %v371_v32 = vrot.slane %v363_v24, %v1089_v14  ;;  %v397_v34 = vcombine.low %v270_v26, %v274_v27  ;;  %v286_v35 = vrot.slane %v228_v19, %v1080_v9  ;;  %v223_v24 = vld [vmem:[%s1058_s6 + $0x20] sm:$0xff] }
  0x63   : > { %v378_v33 = vrot.slane %v364_v25, %v1089_v14  ;;  %v388_v38 = vrot.slane %v380_v28, %v1089_v14  ;;  %v398_v40 = vcombine.low %v278_v30, %v282_v31  ;;  %v290_v41 = vrot.slane %v228_v19, %v1082_v10  ;;  %p807_p2 = pnand %p806_p1, %p800_p4 }
  0x64   : > { %v395_v39 = vrot.slane %v381_v29, %v1089_v14  ;;  %v405_v44 = vrot.slane %v397_v34, %v1089_v14  ;;  %v294_v45 = vrot.slane %v228_v19, %v1084_v11  ;;  %v298_v46 = vrot.slane %v228_v19, %v1086_v12 }
  0x65   : > { %v379_v42 = vcombine.low %v371_v32, %v378_v33  ;;  %v412_v48 = vrot.slane %v398_v40, %v1089_v14  ;;  %v414_v49 = vcombine.low %v286_v35, %v290_v41  ;;  %v302_v50 = vrot.slane %v229_v36, %v1072_v5 }
  0x66   : > { %v396_v47 = vcombine.low %v388_v38, %v395_v39  ;;  %v415_v53 = vcombine.low %v294_v45, %v298_v46  ;;  %v306_v54 = vrot.slane %v229_v36, %v1074_v6  ;;  %v310_v55 = vrot.slane %v229_v36, %v1076_v7  ;;  %v226_v39 = vld [vmem:[%s1058_s6 + $0x38] sm:$0xff] }
  0x67   : > { %v507_v51 = vadd.f32 %v379_v42, %v219_v37  ;;  %v413_v57 = vcombine.low %v405_v44, %v412_v48  ;;  %v422_v58 = vrot.slane %v414_v49, %v1089_v14  ;;  %v314_v59 = vrot.slane %v229_v36, %v1078_v8  ;;  %v225_v37 = vld [vmem:[%s1058_s6 + $0x30] sm:$0xff] }
  0x68   : > { %v508_v56 = vadd.f32 %v396_v47, %v220_v43  ;;  %v429_v61 = vrot.slane %v415_v53, %v1089_v14  ;;  %v431_v62 = vcombine.low %v302_v50, %v306_v54  ;;  %v318_v63 = vrot.slane %v229_v36, %v1080_v9 }
  0x69   : > { %515 = vst [vmem:[%s1126_s21] sm:$0xff] %v507_v51  ;;  %v322_v0 = vrot.slane %v229_v36, %v1082_v10  ;;  %v509_v1 = vadd.f32 %v413_v57, %v221_v52  ;;  %v432_v3 = vcombine.low %v310_v55, %v314_v59  ;;  %v326_v4 = vrot.slane %v229_v36, %v1084_v11 }
  0x6a   : > { %516 = vst [vmem:[%s1126_s21 + $0x8] sm:$0xff] %v508_v56  ;;  %v330_v13 = vrot.slane %v229_v36, %v1086_v12  ;;  %v430_v15 = vcombine.low %v422_v58, %v429_v61  ;;  %v439_v16 = vrot.slane %v431_v62, %v1089_v14  ;;  %v334_v18 = vrot.slane %v230_v60, %v1072_v5 }
  0x6b   : > { %v448_v17 = vcombine.low %v318_v63, %v322_v0  ;;  %517 = vst [vmem:[%s1126_s21 + $0x10] sm:$0xff] %v509_v1  ;;  %v446_v19 = vrot.slane %v432_v3, %v1089_v14  ;;  %v338_v21 = vrot.slane %v230_v60, %v1074_v6  ;;  %v342_v22 = vrot.slane %v230_v60, %v1076_v7  ;;  %v224_v6 = vld [vmem:[%s1058_s6 + $0x28] sm:$0xff] }
  0x6c   : > { %v449_v20 = vcombine.low %v326_v4, %v330_v13  ;;  %v510_v23 = vadd.f32 %v430_v15, %v222_v2  ;;  %v346_v26 = vrot.slane %v230_v60, %v1078_v8  ;;  %v350_v27 = vrot.slane %v230_v60, %v1080_v9 }
  0x6d   : > { %v456_v25 = vrot.slane %v448_v17, %v1089_v14  ;;  %v447_v28 = vcombine.low %v439_v16, %v446_v19  ;;  %v465_v29 = vcombine.low %v334_v18, %v338_v21  ;;  %v354_v30 = vrot.slane %v230_v60, %v1082_v10 }
  0x6e   : > { %v463_v5 = vrot.slane %v449_v20, %v1089_v14  ;;  %518 = vst [vmem:[%s1126_s21 + $0x18] sm:$0xff] %v510_v23  ;;  %v466_v7 = vcombine.low %v342_v22, %v346_v26  ;;  %v358_v31 = vrot.slane %v230_v60, %v1084_v11  ;;  %v362_v8 = vrot.slane %v230_v60, %v1086_v12 }
  0x6f   : > { %v511_v9 = vadd.f32 %v447_v28, %v223_v24  ;;  %v473_v33 = vrot.slane %v465_v29, %v1089_v14  ;;  %v482_v34 = vcombine.low %v350_v27, %v354_v30 }
  0x70   : > { %v464_v32 = vcombine.low %v456_v25, %v463_v5  ;;  %v480_v35 = vrot.slane %v466_v7, %v1089_v14  ;;  %v483_v10 = vcombine.low %v358_v31, %v362_v8 }
  0x71   : > { %519 = vst [vmem:[%s1126_s21 + $0x20] sm:$0xff] %v511_v9  ;;  %v490_v11 = vrot.slane %v482_v34, %v1089_v14 }
  0x72   : > { %v512_v36 = vadd.f32 %v464_v32, %v224_v6  ;;  %v481_v38 = vcombine.low %v473_v33, %v480_v35  ;;  %v497_v12 = vrot.slane %v483_v10, %v1089_v14 }
  0x74   : > { %520 = vst [vmem:[%s1126_s21 + $0x28] sm:$0xff] %v512_v36  ;;  %v513_v40 = vadd.f32 %v481_v38, %v225_v37  ;;  %v498_v41 = vcombine.low %v490_v11, %v497_v12 }
  0x76   : > { %521 = vst [vmem:[%s1126_s21 + $0x30] sm:$0xff] %v513_v40  ;;  %v514_v42 = vadd.f32 %v498_v41, %v226_v39 }
  0x78   : > { %522 = vst [vmem:[%s1126_s21 + $0x38] sm:$0xff] %v514_v42 }
  0x79   : > { %810 = shalt.err (!%p807_p2)
}
  0x7a   : > { %s811_s8 = scalar_lea.hbm %s1166_s27, 1024  ;;  %s815_s4 = scalar_lea.hbm %s1218_s2, 2048 }
  0x7b   : > { %p812_p9 = scmp.ne.s32.totalorder %s1166_s27, %s811_s8  ;;  %p816_p6 = scmp.lt.u32.totalorder %s1166_s27, %s1218_s2 }
  0x7c   : > { %p817_p13 = scmp.lt.u32.totalorder %s815_s4, %s811_s8  ;;  %p819_p0 = scmp.lt.u32.totalorder %s811_s8, %s1166_s27 }
  0x7d   : > { %p813_p11 = pnand %p812_p9, %p1231_p5 }
  0x7e   : > { %p818_p8 = por %p817_p13, %p816_p6 }
  0x7f   : > { %p814_p3 = pneg %p813_p11 }
  0x80   : > { %p820_p7 = por %p819_p0, %p818_p8 }
  0x82   : > { %p821_p4 = pnand %p820_p7, %p814_p3 }
  0x84   : > { %824 = shalt.err (!%p821_p4)
}
  0x85   : > { %673 = dma.vmem_to_hbm [thread:$0]  (%p1231_p5), %s1168_s30, 1024, %s1166_s27, %s524_s28  }
  0x86 PF: > { %s552_s29 = sand.u32 1, %s863_s9   ;;  %p1232_p10 = scmp.ne.s32.totalorder %s1224_s24, 0 }
  0x87   : > { %p1233_p12 = scmp.ge.s32.totalorder %s883_s14, 2  ;;  %s553_s16 = scalar_lea.sflag [#allocation4], %s552_s29 }
  0x89   : > { %p683_p1 = pnand %p1233_p12, %p1232_p10 }
  0x8b   : > { %858 = dma.done.wait (!%p683_p1), %s553_s16, 1024  }
  0x8c   : > { %860 = vsyncadd (!%p683_p1), %s553_s16, 4294966272  ;;  %s21_s14 = sadd.s32 1, %s883_s14   ;;  %s1234_s9 = smov %s867_s10 }
  0x8d   : > { %p18_p2 = scmp.ge.s32.totalorder %s21_s14, 4   ;;  %s1235_s10 = smov %s871_s11 }
  0x8e   : > { %s1236_s11 = smov %s960_s23  ;;  %s1237_s12 = smov %s879_s13 }
  0x8f   : > { %s1238_s13 = smov %s1240_s17  ;;  %20 = sbr.rel (!%p18_p2) target bundleno = 8 (0x8), region = 86 }
  0x96   :  { %558 = vsyncpa [#allocation3], 1 }
  0x97   :  { %560 = vsyncpa [#allocation3 + $0x1], 1 }
  0x98   :  { %561 = vsyncpa [#allocation6], 1 }
  0x99   :  { %563 = vsyncpa [#allocation6 + $0x1], 1 }
  0x9a   :  { %564 = vsyncpa [#allocation4], 1 }
  0x9b   :  { %566 = vsyncpa [#allocation4 + $0x1], 1 }

</bundles_post_ra>
